<compile_context>
chip_gen: v7x
topology: tpu7x:2x2x1
jax: 0.10.0
libtpu: 0.0.40
codegen_flags: <defaults>
</compile_context>

<pallas_src>
import jax
import jax.numpy as jnp
from jax.experimental import pallas as pl
from jax.experimental.pallas import tpu as pltpu


def _round_up(x, m):
    return ((x + m - 1) // m) * m


def _gnn_fused_kernel(x_ref, adj_ref, w1_ref, b1_ref, w2_ref, b2_ref,
                      out_ref, support_ref, h_ref, acc_ref):
    l = pl.program_id(0)          # layer (0 or 1)
    i = pl.program_id(1)          # output row tile
    k = pl.program_id(2)          # reduction tile over adj columns
    nk = pl.num_programs(2)

    tm = acc_ref.shape[0]
    tk = adj_ref.shape[1]

    # Build the dense "support" matrix once per layer (first grid step of the
    # layer), not once per (i, k) tile.
    @pl.when(jnp.logical_and(i == 0, k == 0))
    def _():
        @pl.when(l == 0)
        def _():
            support_ref[...] = jnp.dot(x_ref[...], w1_ref[...],
                                       preferred_element_type=jnp.float32)

        @pl.when(l == 1)
        def _():
            support_ref[...] = jnp.dot(h_ref[...], w2_ref[...],
                                       preferred_element_type=jnp.float32)

    # Zero the accumulator at the start of each reduction.
    @pl.when(k == 0)
    def _():
        acc_ref[...] = jnp.zeros_like(acc_ref)

    # acc += adj[i, k] @ support[k]   (MXU, f32 accumulation)
    k_start = pl.multiple_of(k * tk, 128)
    acc_ref[...] += jnp.dot(adj_ref[...],
                            support_ref[pl.ds(k_start, tk), :],
                            preferred_element_type=jnp.float32)

    # Finalize: bias (+ ReLU for layer 0) only once, at the last k step.
    @pl.when(k == nk - 1)
    def _():
        @pl.when(l == 0)
        def _():
            h_blk = jnp.maximum(acc_ref[...] + b1_ref[...], 0.0)
            i_start = pl.multiple_of(i * tm, 128)
            h_ref[pl.ds(i_start, tm), :] = h_blk
            out_ref[...] = h_blk.astype(out_ref.dtype)

        @pl.when(l == 1)
        def _():
            out_ref[...] = (acc_ref[...] + b2_ref[...]).astype(out_ref.dtype)


def gnn4classlevel_forward(x, adj, params):
    """Pallas implementation of GNN4ClassLevel.forward (w1=b1=w2=b2=None)."""
    w1, b1, w2, b2 = params["w1"], params["b1"], params["w2"], params["b2"]
    n, nfeat = x.shape
    nhid = w1.shape[1]

    lane = 128
    f_pad = _round_up(max(nfeat, lane), lane)
    h_pad = _round_up(max(nhid, lane), lane)

    # Pick tiles that divide the padded node count (all multiples of 128).
    n_pad = _round_up(n, lane)
    tk = next(t for t in (512, 256, 128) if t <= n_pad and n_pad % t == 0)
    tm = 256 if (n_pad % 256 == 0) else 128

    f32 = jnp.float32
    x_p = jnp.zeros((n_pad, f_pad), f32).at[:n, :nfeat].set(x.astype(f32))
    adj_p = jnp.zeros((n_pad, n_pad), f32).at[:n, :n].set(adj.astype(f32))
    w1_p = jnp.zeros((f_pad, h_pad), f32).at[:nfeat, :nhid].set(w1.astype(f32))
    b1_p = jnp.zeros((1, h_pad), f32).at[:, :nhid].set(b1.reshape(1, nhid).astype(f32))
    w2_p = jnp.zeros((h_pad, h_pad), f32).at[:nhid, :nhid].set(w2.astype(f32))
    b2_p = jnp.zeros((1, h_pad), f32).at[:, :nhid].set(b2.reshape(1, nhid).astype(f32))

    grid = (2, n_pad // tm, n_pad // tk)

    # Rough VMEM budget; only raise the scoped limit if the default (32 MiB)
    # would be exceeded, and never above the smallest physical VMEM (v7x 64MiB).
    est_bytes = 4 * (
        2 * tm * tk              # adj tiles, double-buffered
        + n_pad * f_pad          # x, resident (constant block)
        + f_pad * h_pad + h_pad * h_pad + 2 * h_pad   # weights / biases
        + 2 * tm * h_pad         # output tiles, double-buffered
        + 2 * n_pad * h_pad      # support + h scratch
        + tm * h_pad             # accumulator
    )
    cp_kwargs = dict(dimension_semantics=("arbitrary", "arbitrary", "arbitrary"))
    if est_bytes > (32 << 20):
        cp_kwargs["vmem_limit_bytes"] = min(int(est_bytes * 3) // 2, 64 << 20)

    out = pl.pallas_call(
        _gnn_fused_kernel,
        out_shape=jax.ShapeDtypeStruct((2, n_pad, h_pad), jnp.float32),
        grid_spec=pltpu.PrefetchScalarGridSpec(
            num_scalar_prefetch=0,
            grid=grid,
            in_specs=[
                pl.BlockSpec((n_pad, f_pad), lambda l, i, k: (0, 0)),   # x (resident)
                pl.BlockSpec((tm, tk), lambda l, i, k: (i, k)),         # adj (streamed)
                pl.BlockSpec((f_pad, h_pad), lambda l, i, k: (0, 0)),   # W1
                pl.BlockSpec((1, h_pad), lambda l, i, k: (0, 0)),       # b1
                pl.BlockSpec((h_pad, h_pad), lambda l, i, k: (0, 0)),   # W2
                pl.BlockSpec((1, h_pad), lambda l, i, k: (0, 0)),       # b2
            ],
            out_specs=pl.BlockSpec((None, tm, h_pad), lambda l, i, k: (l, i, 0)),
            scratch_shapes=[
                pltpu.VMEM((n_pad, h_pad), jnp.float32),   # support = prev @ W
                pltpu.VMEM((n_pad, h_pad), jnp.float32),   # h (layer-0 output)
                pltpu.VMEM((tm, h_pad), jnp.float32),      # accumulator
            ],
        ),
        compiler_params=pltpu.CompilerParams(**cp_kwargs),
    )(x_p, adj_p, w1_p, b1_p, w2_p, b2_p)

    # out[0] holds h (debug only); out[1] holds the layer-2 result.
    # TODO(synk): dropout is identity here (inference / training=False path).
    return out[1, :n, :nhid]


def init_params(key, nfeat, nhid):
    """Deterministic re-implementation of GraphNeuralClass.reset_parameters."""
    k1, k2, k3, k4 = jax.random.split(key, 4)
    stdv1 = 1.0 / jnp.sqrt(jnp.float32(nhid))
    stdv2 = 1.0 / jnp.sqrt(jnp.float32(nhid))
    w1 = jax.random.uniform(k1, (nfeat, nhid), jnp.float32, -stdv1, stdv1)
    b1 = jax.random.uniform(k2, (1, nhid), jnp.float32, -stdv1, stdv1)
    w2 = jax.random.uniform(k3, (nhid, nhid), jnp.float32, -stdv2, stdv2)
    b2 = jax.random.uniform(k4, (1, nhid), jnp.float32, -stdv2, stdv2)
    # NOTE: self.generater (Linear) and permute() are never used in forward().
    return {"w1": w1, "b1": b1, "w2": w2, "b2": b2}


def reference_forward(x, adj, params):
    h = jnp.maximum(adj @ (x @ params["w1"]) + params["b1"], 0.0)
    return adj @ (h @ params["w2"]) + params["b2"]


if __name__ == "__main__":
    N, NFEAT, NHID = 64, 32, 32
    key = jax.random.PRNGKey(0)
    kx, kadj, kp = jax.random.split(key, 3)

    x = jax.random.normal(kx, (N, NFEAT), jnp.float32)
    # symmetric-ish random adjacency with self loops, row-normalized
    a = (jax.random.uniform(kadj, (N, N)) > 0.7).astype(jnp.float32)
    adj = a + a.T + jnp.eye(N, dtype=jnp.float32)
    adj = adj / jnp.sum(adj, axis=1, keepdims=True)

    params = init_params(kp, NFEAT, NHID)

    out = gnn4classlevel_forward(x, adj, params)
    out = jax.block_until_ready(out)

    ref = reference_forward(x, adj, params)
    assert out.shape == (N, NHID)
    assert jnp.allclose(out, ref, atol=1e-4, rtol=1e-4)

    print("KERNEL_OK")
</pallas_src>

<mosaic_0001>
module attributes {stable_mosaic.version = 11 : i64} {
  func.func @_gnn_fused_kernel(%arg0: i32, %arg1: i32, %arg2: i32, %arg3: memref<128x128xf32, #tpu.memory_space<vmem>>, %arg4: memref<128x128xf32, #tpu.memory_space<vmem>>, %arg5: memref<128x128xf32, #tpu.memory_space<vmem>>, %arg6: memref<1x128xf32, #tpu.memory_space<vmem>>, %arg7: memref<128x128xf32, #tpu.memory_space<vmem>>, %arg8: memref<1x128xf32, #tpu.memory_space<vmem>>, %arg9: memref<1x128x128xf32, #tpu.memory_space<vmem>>, %arg10: memref<128x128xf32, #tpu.memory_space<vmem>>, %arg11: memref<128x128xf32, #tpu.memory_space<vmem>>, %arg12: memref<128x128xf32, #tpu.memory_space<vmem>>) attributes {dimension_semantics = [#tpu.dimension_semantics<arbitrary>, #tpu.dimension_semantics<arbitrary>, #tpu.dimension_semantics<arbitrary>], iteration_bounds = array<i64: 2, 1, 1>, scalar_prefetch = 0 : i64, scratch_operands = 3 : i64, tpu.core_type = #tpu.core_type<tc>, window_params = [{pipeline_mode = #tpu.pipeline_mode<synchronous>, transform_indices = @transform_0, window_bounds = array<i64: 128, 128>}, {transform_indices = @transform_1, window_bounds = array<i64: 128, 128>}, {pipeline_mode = #tpu.pipeline_mode<synchronous>, transform_indices = @transform_2, window_bounds = array<i64: 128, 128>}, {pipeline_mode = #tpu.pipeline_mode<synchronous>, transform_indices = @transform_3, window_bounds = array<i64: 1, 128>}, {pipeline_mode = #tpu.pipeline_mode<synchronous>, transform_indices = @transform_4, window_bounds = array<i64: 128, 128>}, {pipeline_mode = #tpu.pipeline_mode<synchronous>, transform_indices = @transform_5, window_bounds = array<i64: 1, 128>}, {transform_indices = @transform_6, window_bounds = array<i64: 1, 128, 128>}]} {
    %c0_i32 = arith.constant 0 : i32
    %0 = arith.cmpi eq, %arg1, %c0_i32 : i32
    %c0_i32_0 = arith.constant 0 : i32
    %1 = arith.cmpi eq, %arg2, %c0_i32_0 : i32
    %2 = arith.andi %0, %1 : i1
    %3 = arith.extui %2 : i1 to i32
    %c0_i32_1 = arith.constant 0 : i32
    %4 = arith.cmpi ne, %3, %c0_i32_1 : i32
    scf.if %4 {
      %c0_i32_12 = arith.constant 0 : i32
      %20 = arith.cmpi eq, %arg0, %c0_i32_12 : i32
      %21 = arith.extui %20 : i1 to i32
      %c0_i32_13 = arith.constant 0 : i32
      %22 = arith.cmpi ne, %21, %c0_i32_13 : i32
      scf.if %22 {
        %c0_15 = arith.constant 0 : index
        %c0_16 = arith.constant 0 : index
        %26 = vector.load %arg3[%c0_15, %c0_16] : memref<128x128xf32, #tpu.memory_space<vmem>>, vector<128x128xf32>
        %c0_17 = arith.constant 0 : index
        %c0_18 = arith.constant 0 : index
        %27 = vector.load %arg5[%c0_17, %c0_18] : memref<128x128xf32, #tpu.memory_space<vmem>>, vector<128x128xf32>
        %cst_19 = arith.constant dense<0.000000e+00> : vector<128x128xf32>
        %28 = tpu.matmul %26, %27, %cst_19 {dimension_numbers = #tpu.dot_dimension_numbers<[1], [0], [0], [1], [0, 0, 1, 1], [], []>} : vector<128x128xf32>, vector<128x128xf32>, vector<128x128xf32> -> vector<128x128xf32>
        %c0_20 = arith.constant 0 : index
        %c0_21 = arith.constant 0 : index
        %29 = vector.load %arg10[%c0_20, %c0_21] : memref<128x128xf32, #tpu.memory_space<vmem>>, vector<128x128xf32>
        tpu.vector_store %arg10[%c0_20, %c0_21], %28 {strides = array<i32>} : memref<128x128xf32, #tpu.memory_space<vmem>>, vector<128x128xf32>,
      } else {
      }
      %c1_i32 = arith.constant 1 : i32
      %23 = arith.cmpi eq, %arg0, %c1_i32 : i32
      %24 = arith.extui %23 : i1 to i32
      %c0_i32_14 = arith.constant 0 : i32
      %25 = arith.cmpi ne, %24, %c0_i32_14 : i32
      scf.if %25 {
        %c0_15 = arith.constant 0 : index
        %c0_16 = arith.constant 0 : index
        %26 = vector.load %arg11[%c0_15, %c0_16] : memref<128x128xf32, #tpu.memory_space<vmem>>, vector<128x128xf32>
        %c0_17 = arith.constant 0 : index
        %c0_18 = arith.constant 0 : index
        %27 = vector.load %arg7[%c0_17, %c0_18] : memref<128x128xf32, #tpu.memory_space<vmem>>, vector<128x128xf32>
        %cst_19 = arith.constant dense<0.000000e+00> : vector<128x128xf32>
        %28 = tpu.matmul %26, %27, %cst_19 {dimension_numbers = #tpu.dot_dimension_numbers<[1], [0], [0], [1], [0, 0, 1, 1], [], []>} : vector<128x128xf32>, vector<128x128xf32>, vector<128x128xf32> -> vector<128x128xf32>
        %c0_20 = arith.constant 0 : index
        %c0_21 = arith.constant 0 : index
        %29 = vector.load %arg10[%c0_20, %c0_21] : memref<128x128xf32, #tpu.memory_space<vmem>>, vector<128x128xf32>
        tpu.vector_store %arg10[%c0_20, %c0_21], %28 {strides = array<i32>} : memref<128x128xf32, #tpu.memory_space<vmem>>, vector<128x128xf32>,
      } else {
      }
    } else {
    }
    %c0_i32_2 = arith.constant 0 : i32
    %5 = arith.cmpi eq, %arg2, %c0_i32_2 : i32
    %6 = arith.extui %5 : i1 to i32
    %c0_i32_3 = arith.constant 0 : i32
    %7 = arith.cmpi ne, %6, %c0_i32_3 : i32
    scf.if %7 {
      %cst_12 = arith.constant 0.000000e+00 : f32
      %20 = vector.broadcast %cst_12 : f32 to vector<128x128xf32>
      %c0_13 = arith.constant 0 : index
      %c0_14 = arith.constant 0 : index
      %21 = vector.load %arg12[%c0_13, %c0_14] : memref<128x128xf32, #tpu.memory_space<vmem>>, vector<128x128xf32>
      tpu.vector_store %arg12[%c0_13, %c0_14], %20 {strides = array<i32>} : memref<128x128xf32, #tpu.memory_space<vmem>>, vector<128x128xf32>,
    } else {
    }
    %c128_i32 = arith.constant 128 : i32
    %8 = arith.muli %arg2, %c128_i32 : i32
    %9 = tpu.assume_multiple %8, 128 : i32
    %c0 = arith.constant 0 : index
    %c0_4 = arith.constant 0 : index
    %10 = vector.load %arg12[%c0, %c0_4] : memref<128x128xf32, #tpu.memory_space<vmem>>, vector<128x128xf32>
    %c0_5 = arith.constant 0 : index
    %c0_6 = arith.constant 0 : index
    %11 = vector.load %arg4[%c0_5, %c0_6] : memref<128x128xf32, #tpu.memory_space<vmem>>, vector<128x128xf32>
    %12 = arith.index_cast %9 : i32 to index
    %c0_7 = arith.constant 0 : index
    %13 = vector.load %arg10[%12, %c0_7] : memref<128x128xf32, #tpu.memory_space<vmem>>, vector<128x128xf32>
    %cst = arith.constant dense<0.000000e+00> : vector<128x128xf32>
    %14 = tpu.matmul %11, %13, %cst {dimension_numbers = #tpu.dot_dimension_numbers<[1], [0], [0], [1], [0, 0, 1, 1], [], []>} : vector<128x128xf32>, vector<128x128xf32>, vector<128x128xf32> -> vector<128x128xf32>
    %15 = arith.addf %10, %14 : vector<128x128xf32>
    %c0_8 = arith.constant 0 : index
    %c0_9 = arith.constant 0 : index
    %16 = vector.load %arg12[%c0_8, %c0_9] : memref<128x128xf32, #tpu.memory_space<vmem>>, vector<128x128xf32>
    tpu.vector_store %arg12[%c0_8, %c0_9], %15 {strides = array<i32>} : memref<128x128xf32, #tpu.memory_space<vmem>>, vector<128x128xf32>,
    %c0_i32_10 = arith.constant 0 : i32
    %17 = arith.cmpi eq, %arg2, %c0_i32_10 : i32
    %18 = arith.extui %17 : i1 to i32
    %c0_i32_11 = arith.constant 0 : i32
    %19 = arith.cmpi ne, %18, %c0_i32_11 : i32
    scf.if %19 {
      %c0_i32_12 = arith.constant 0 : i32
      %20 = arith.cmpi eq, %arg0, %c0_i32_12 : i32
      %21 = arith.extui %20 : i1 to i32
      %c0_i32_13 = arith.constant 0 : i32
      %22 = arith.cmpi ne, %21, %c0_i32_13 : i32
      scf.if %22 {
        %c0_15 = arith.constant 0 : index
        %c0_16 = arith.constant 0 : index
        %26 = vector.load %arg12[%c0_15, %c0_16] : memref<128x128xf32, #tpu.memory_space<vmem>>, vector<128x128xf32>
        %c0_17 = arith.constant 0 : index
        %c0_18 = arith.constant 0 : index
        %27 = vector.load %arg6[%c0_17, %c0_18] : memref<1x128xf32, #tpu.memory_space<vmem>>, vector<1x128xf32>
        %28 = vector.broadcast %27 : vector<1x128xf32> to vector<128x128xf32>
        %29 = arith.addf %26, %28 : vector<128x128xf32>
        %cst_19 = arith.constant 0.000000e+00 : f32
        %30 = vector.broadcast %cst_19 : f32 to vector<128x128xf32>
        %31 = arith.maximumf %29, %30 : vector<128x128xf32>
        %c128_i32_20 = arith.constant 128 : i32
        %32 = arith.muli %arg1, %c128_i32_20 : i32
        %33 = tpu.assume_multiple %32, 128 : i32
        %34 = arith.index_cast %33 : i32 to index
        %c0_21 = arith.constant 0 : index
        %35 = vector.load %arg11[%34, %c0_21] : memref<128x128xf32, #tpu.memory_space<vmem>>, vector<128x128xf32>
        tpu.vector_store %arg11[%34, %c0_21], %31 {strides = array<i32>} : memref<128x128xf32, #tpu.memory_space<vmem>>, vector<128x128xf32>,
        %c0_22 = arith.constant 0 : index
        %c0_23 = arith.constant 0 : index
        %c0_24 = arith.constant 0 : index
        %36 = vector.load %arg9[%c0_22, %c0_23, %c0_24] : memref<1x128x128xf32, #tpu.memory_space<vmem>>, vector<1x128x128xf32>
        %37 = vector.shape_cast %36 : vector<1x128x128xf32> to vector<128x128xf32>
        %38 = vector.shape_cast %31 : vector<128x128xf32> to vector<1x128x128xf32>
        tpu.vector_store %arg9[%c0_22, %c0_23, %c0_24], %38 {strides = array<i32>} : memref<1x128x128xf32, #tpu.memory_space<vmem>>, vector<1x128x128xf32>,
      } else {
      }
      %c1_i32 = arith.constant 1 : i32
      %23 = arith.cmpi eq, %arg0, %c1_i32 : i32
      %24 = arith.extui %23 : i1 to i32
      %c0_i32_14 = arith.constant 0 : i32
      %25 = arith.cmpi ne, %24, %c0_i32_14 : i32
      scf.if %25 {
        %c0_15 = arith.constant 0 : index
        %c0_16 = arith.constant 0 : index
        %26 = vector.load %arg12[%c0_15, %c0_16] : memref<128x128xf32, #tpu.memory_space<vmem>>, vector<128x128xf32>
        %c0_17 = arith.constant 0 : index
        %c0_18 = arith.constant 0 : index
        %27 = vector.load %arg8[%c0_17, %c0_18] : memref<1x128xf32, #tpu.memory_space<vmem>>, vector<1x128xf32>
        %28 = vector.broadcast %27 : vector<1x128xf32> to vector<128x128xf32>
        %29 = arith.addf %26, %28 : vector<128x128xf32>
        %c0_19 = arith.constant 0 : index
        %c0_20 = arith.constant 0 : index
        %c0_21 = arith.constant 0 : index
        %30 = vector.load %arg9[%c0_19, %c0_20, %c0_21] : memref<1x128x128xf32, #tpu.memory_space<vmem>>, vector<1x128x128xf32>
        %31 = vector.shape_cast %30 : vector<1x128x128xf32> to vector<128x128xf32>
        %32 = vector.shape_cast %29 : vector<128x128xf32> to vector<1x128x128xf32>
        tpu.vector_store %arg9[%c0_19, %c0_20, %c0_21], %32 {strides = array<i32>} : memref<1x128x128xf32, #tpu.memory_space<vmem>>, vector<1x128x128xf32>,
      } else {
      }
    } else {
    }
    return
  }
  func.func @transform_0(%arg0: i32, %arg1: i32, %arg2: i32) -> (i32, i32) {
    %c0_i32 = arith.constant 0 : i32
    %c0_i32_0 = arith.constant 0 : i32
    %c0_i32_1 = arith.constant 0 : i32
    return %c0_i32, %c0_i32_0 : i32, i32
  }
  func.func @transform_1(%arg0: i32, %arg1: i32, %arg2: i32) -> (i32, i32) {
    %c0_i32 = arith.constant 0 : i32
    return %arg1, %arg2 : i32, i32
  }
  func.func @transform_2(%arg0: i32, %arg1: i32, %arg2: i32) -> (i32, i32) {
    %c0_i32 = arith.constant 0 : i32
    %c0_i32_0 = arith.constant 0 : i32
    %c0_i32_1 = arith.constant 0 : i32
    return %c0_i32, %c0_i32_0 : i32, i32
  }
  func.func @transform_3(%arg0: i32, %arg1: i32, %arg2: i32) -> (i32, i32) {
    %c0_i32 = arith.constant 0 : i32
    %c0_i32_0 = arith.constant 0 : i32
    %c0_i32_1 = arith.constant 0 : i32
    return %c0_i32, %c0_i32_0 : i32, i32
  }
  func.func @transform_4(%arg0: i32, %arg1: i32, %arg2: i32) -> (i32, i32) {
    %c0_i32 = arith.constant 0 : i32
    %c0_i32_0 = arith.constant 0 : i32
    %c0_i32_1 = arith.constant 0 : i32
    return %c0_i32, %c0_i32_0 : i32, i32
  }
  func.func @transform_5(%arg0: i32, %arg1: i32, %arg2: i32) -> (i32, i32) {
    %c0_i32 = arith.constant 0 : i32
    %c0_i32_0 = arith.constant 0 : i32
    %c0_i32_1 = arith.constant 0 : i32
    return %c0_i32, %c0_i32_0 : i32, i32
  }
  func.func @transform_6(%arg0: i32, %arg1: i32, %arg2: i32) -> (i32, i32, i32) {
    %c0_i32 = arith.constant 0 : i32
    %c0_i32_0 = arith.constant 0 : i32
    return %arg0, %arg1, %c0_i32 : i32, i32, i32
  }
}

</mosaic_0001>

<bundles_post_ra>
// kernel: tpu_custom_call.1
= control target key start
LH: loop header
LB: loop body
LE: loop exit
PB: predicated region body
PF: predicated region fallthrough
CT: control target
= control target key end

     0   :  { %s2320_s0 = inlined_call_operand.hbm [shape: f32[128,128], index: 0, kind: input, shape index: {}]   ;;  %s2321_s1 = inlined_call_operand.hbm [shape: f32[128,128], index: 1, kind: input, shape index: {}]   ;;  %s2322_s2 = inlined_call_operand.hbm [shape: f32[128,128], index: 2, kind: input, shape index: {}]   ;;  %s2323_s3 = inlined_call_operand.vmem [shape: f32[1,128], index: 3, kind: input, shape index: {}]   ;;  %s2324_s4 = inlined_call_operand.hbm [shape: f32[128,128], index: 4, kind: input, shape index: {}]   ;;  %s2325_s5 = inlined_call_operand.vmem [shape: f32[1,128], index: 5, kind: input, shape index: {}]   ;;  %s2326_s6 = inlined_call_operand.hbm [shape: f32[2,128,128], index: 6, kind: output, shape index: {}]  }
   0x1   :  { %2334 = sst [smem:[#allocation22_spill]] %s2321_s1 }
   0x2   :  { %11 = vsyncpa [#allocation6], 0 }
   0x3   :  { %12 = vsyncpa [#allocation9], 0 }
   0x4   :  { %13 = vsyncpa [#allocation12], 0 }
   0x5   :  { %14 = vsyncpa [#allocation7], 0 }
   0x6   :  { %16 = vsyncpa [#allocation7 + $0x1], 0  ;;  %s2035_s21 = smov 0   ;;  %s2037_s22 = smov 0  }
   0x7   :  { %s2039_s23 = smov 0   ;;  %s2041_s24 = smov 0  }
   0x8   :  { %s2043_s25 = smov 0   ;;  %s2045_s26 = smov 0  }
   0x9 LB: > { %2335 = sst [smem:[#allocation18_spill]] %s1977_s23  ;;  %s1253_s27 = sadd.s32 4294967295, %s1989_s26   ;;  %s1989_s26 = sphi %s2045_s26, %s22_s26   ;;  %s1985_s25 = sphi %s2043_s25, %s2353_s25   ;;  %s1981_s24 = sphi %s2041_s24, %s2352_s24   ;;  %s1977_s23 = sphi %s2039_s23, %s2351_s23   ;;  %s1973_s22 = sphi %s2037_s22, %s2355_s22   ;;  %s1969_s21 = sphi %s2035_s21, %s2354_s21  }
   0xa   : > { %2336 = sst [smem:[#allocation19_spill]] %s1985_s25  ;;  %s1254_s28 = sadd.s32 4294967294, %s1989_s26  }
   0xb   : > { %s41_s29 = sadd.s32 1, %s1985_s25  ;;  %s183_s30 = sadd.s32 1, %s1977_s23 }
   0xc   : > { %p43_p0 = scmp.ge.s32.totalorder %s41_s29, 2  ;;  %p193_p1 = scmp.ne.s32.totalorder %s1977_s23, %s1973_s22 }
   0xd   : > { %p194_p2 = scmp.eq.s32.totalorder %s1253_s27, 1  ;;  %p199_p3 = scmp.ne.s32.totalorder %s1973_s22, %s1969_s21 }
   0xe   : > { %s2357_s29 = smov (%p43_p0, %s41_s29), 0  ;;  %p200_p5 = scmp.eq.s32.totalorder %s1254_s28, 1 }
   0xf   : > { %2337 = sst [smem:[#allocation20_spill]] %s2357_s29  ;;  %p2075_p4 = por %p194_p2, %p193_p1 }
  0x10   : > { %s178_s8 = ssub.s32 %s1985_s25, %s2357_s29  ;;  %p1255_p6 = scmp.ge.s32.totalorder %s1989_s26, 1 }
  0x11   : > { %s2338_s7 = scalar_select %p2075_p4, 1, 0 }
  0x12   : > { %p181_p7 = scmp.eq.s32.totalorder %s178_s8, 0  ;;  %p2082_p8 = por %p200_p5, %p199_p3 }
  0x13   : > { %p207_p9 = scmp.lt.s32.totalorder %s1989_s26, 3  ;;  %p2094_p11 = scmp.eq.s32.totalorder %s1253_s27, 0 }
  0x14   : > { %s2339_s9 = scalar_select %p2082_p8, 1, 0 }
  0x15   : > { %s2088_s10 = scalar_select %p181_p7, %s1977_s23, %s183_s30  }
  0x16   : > { %p2090_p10 = pnand %p1255_p6, %p207_p9  ;;  %s1991_s13 = smov [#allocation8]  }
  0x17   : > { %2340 = sst [smem:[#allocation21_spill]] %s2088_s10  ;;  %s236_s14 = sshll.u32 %s1991_s13, 4  ;;  %s237_s14 = int_to_ptr.vmem [resolvable:$true] %s236_s14 }
  0x18   : > { %s2341_s11 = scalar_select %p2090_p10, 1, 0 }
  0x19   : > { %s2342_s12 = scalar_select %p2094_p11, 1, 0 }
  0x1a   : > { %p1704_p12 = pneg %p2090_p10  ;;  %s1992_s16 = smov [#allocation5]  }
  0x1b   : > { %s219_s17 = sshll.u32 %s1992_s16, 4  ;;  %s2344_s1 = sld [smem:[#allocation22_spill]]  ;;  %s220_s17 = int_to_ptr.vmem [resolvable:$true] %s219_s17 }
  0x1c   : > { %p2102_p13 = pnand %p2094_p11, %p1704_p12 }
  0x1e   : > { %p2114_p1 = pneg %p2102_p13 }
  0x21   : > { %s1787_s20 = scalar_lea.hbm %s2344_s1, 2048 }
  0x22   : > { %p1788_p0 = scmp.ne.s32.totalorder %s2344_s1, %s1787_s20  ;;  %p1794_p5 = scmp.lt.u32.totalorder %s1787_s20, %s2344_s1 }
  0x24   : > { %p1790_p2 = pnand %p2114_p1, %p1788_p0 }
  0x26   : > { %p1791_p3 = pneg %p1790_p2 }
  0x28   : > { %p1796_p6 = pnand %p1794_p5, %p1791_p3 }
  0x2a   : > { %1799 = shalt.err (!%p1796_p6)
}
  0x2b   : > { %s1800_s16 = scalar_lea.vmem %s237_s14, 2048  ;;  %p1808_p8 = scmp.lt.s32.totalorder %s237_s14, %s237_s14 }
  0x2c   : > { %p1801_p7 = scmp.ne.s32.totalorder %s237_s14, %s1800_s16  ;;  %p1809_p4 = scmp.lt.s32.totalorder %s1800_s16, %s1800_s16 }
  0x2e   : > { %p1803_p9 = pnand %p1801_p7, %p2114_p1  ;;  %p1810_p11 = por %p1809_p4, %p1808_p8 }
  0x30   : > { %p1804_p12 = pneg %p1803_p9 }
  0x32   : > { %p1811_p10 = pnand %p1810_p11, %p1804_p12 }
  0x34   : > { %1814 = shalt.err (!%p1811_p10)
}
  0x35   : > { %s1993_s18 = smov 128   ;;  %s1994_s19 = smov 8  }
  0x36   : > { %1710 = dma.hbm_to_vmem [thread:$0]  (!%p2102_p13), %s2344_s1, 2048, %s237_s14, [#allocation9], %s1993_s18, %s1993_s18, %s1994_s19  }
  0x37   : > { %s1815_s13 = scalar_lea.hbm %s2320_s0, 2048 }
  0x38   : > { %p1816_p4 = scmp.ne.s32.totalorder %s2320_s0, %s1815_s13  ;;  %p1822_p11 = scmp.lt.u32.totalorder %s1815_s13, %s2320_s0 }
  0x3a   : > { %p1818_p8 = pnand %p1816_p4, %p2114_p1 }
  0x3c   : > { %p1819_p10 = pneg %p1818_p8 }
  0x3e   : > { %p1824_p0 = pnand %p1822_p11, %p1819_p10 }
  0x40   : > { %1827 = shalt.err (!%p1824_p0)
}
  0x41   : > { %s1828_s20 = scalar_lea.vmem %s220_s17, 2048  ;;  %p1836_p6 = scmp.lt.s32.totalorder %s220_s17, %s220_s17 }
  0x42   : > { %p1829_p2 = scmp.ne.s32.totalorder %s220_s17, %s1828_s20  ;;  %p1837_p7 = scmp.lt.s32.totalorder %s1828_s20, %s1828_s20 }
  0x44   : > { %p1831_p3 = pnand %p1829_p2, %p2114_p1  ;;  %p1838_p9 = por %p1837_p7, %p1836_p6 }
  0x46   : > { %p1832_p5 = pneg %p1831_p3 }
  0x48   : > { %p1839_p12 = pnand %p1838_p9, %p1832_p5 }
  0x4a   : > { %1842 = shalt.err (!%p1839_p12)
}
  0x4b   : > { %1707 = dma.hbm_to_vmem [thread:$0]  (!%p2102_p13), %s2320_s0, 2048, %s220_s17, [#allocation6], %s1993_s18, %s1993_s18, %s1994_s19  }
  0x4c   : > { %s1995_s10 = smov [#allocation10]   ;;  %s1996_s27 = smov [#allocation11]  }
  0x4d   : > { %s249_s14 = sshll.u32 %s1995_s10, 4  ;;  %s265_s28 = sshll.u32 %s1996_s27, 4  ;;  %s250_s14 = int_to_ptr.vmem [resolvable:$true] %s249_s14  ;;  %s266_s28 = int_to_ptr.vmem [resolvable:$true] %s265_s28 }
  0x4e   : > { %s1843_s16 = scalar_lea.hbm %s2322_s2, 2048 }
  0x4f   : > { %p1844_p4 = scmp.ne.s32.totalorder %s2322_s2, %s1843_s16  ;;  %p1850_p11 = scmp.lt.u32.totalorder %s1843_s16, %s2322_s2 }
  0x51   : > { %p1846_p8 = pnand %p1844_p4, %p2114_p1 }
  0x53   : > { %p1847_p10 = pneg %p1846_p8 }
  0x55   : > { %p1852_p0 = pnand %p1850_p11, %p1847_p10 }
  0x57   : > { %1855 = shalt.err (!%p1852_p0)
}
  0x58   : > { %s1856_s17 = scalar_lea.vmem %s250_s14, 2048  ;;  %p1864_p6 = scmp.lt.s32.totalorder %s250_s14, %s250_s14 }
  0x59   : > { %p1857_p2 = scmp.ne.s32.totalorder %s250_s14, %s1856_s17  ;;  %p1865_p7 = scmp.lt.s32.totalorder %s1856_s17, %s1856_s17 }
  0x5b   : > { %p1859_p3 = pnand %p1857_p2, %p2114_p1  ;;  %p1866_p9 = por %p1865_p7, %p1864_p6 }
  0x5d   : > { %p1860_p5 = pneg %p1859_p3 }
  0x5f   : > { %p1867_p12 = pnand %p1866_p9, %p1860_p5 }
  0x61   : > { %1870 = shalt.err (!%p1867_p12)
}
  0x62   : > { %1713 = dma.hbm_to_vmem [thread:$0]  (!%p2102_p13), %s2322_s2, 2048, %s250_s14, [#allocation9], %s1993_s18, %s1993_s18, %s1994_s19  }
  0x63   : > { %s1871_s27 = scalar_lea.hbm %s2324_s4, 2048 }
  0x64   : > { %p1872_p4 = scmp.ne.s32.totalorder %s2324_s4, %s1871_s27  ;;  %p1878_p11 = scmp.lt.u32.totalorder %s1871_s27, %s2324_s4 }
  0x66   : > { %p1874_p8 = pnand %p1872_p4, %p2114_p1 }
  0x68   : > { %p1875_p10 = pneg %p1874_p8 }
  0x6a   : > { %p1880_p0 = pnand %p1878_p11, %p1875_p10 }
  0x6c   : > { %1883 = shalt.err (!%p1880_p0)
}
  0x6d   : > { %s1884_s25 = scalar_lea.vmem %s266_s28, 2048  ;;  %p1892_p6 = scmp.lt.s32.totalorder %s266_s28, %s266_s28 }
  0x6e   : > { %p1885_p2 = scmp.ne.s32.totalorder %s266_s28, %s1884_s25  ;;  %p1893_p7 = scmp.lt.s32.totalorder %s1884_s25, %s1884_s25 }
  0x70   : > { %p1887_p3 = pnand %p1885_p2, %p2114_p1  ;;  %p1894_p9 = por %p1893_p7, %p1892_p6 }
  0x72   : > { %p1888_p5 = pneg %p1887_p3 }
  0x74   : > { %p1895_p12 = pnand %p1894_p9, %p1888_p5 }
  0x76   : > { %1898 = shalt.err (!%p1895_p12)
}
  0x77   : > { %1716 = dma.hbm_to_vmem [thread:$0]  (!%p2102_p13), %s2324_s4, 2048, %s266_s28, [#allocation12], %s1993_s18, %s1993_s18, %s1994_s19  }
  0x78   : > { %p2346_p4 = scmp.ne.s32.totalorder %s2341_s11, 0 }
  0x79   : > { %p2347_p1 = scmp.ne.s32.totalorder (!%p2346_p4), %s2342_s12, 0 }
  0x7a   : > { %284 = sbr.rel (%p2346_p4) target bundleno = 973 (0x3cd), region = 44 }
  0x81   : > { %1952 = dma.done.wait (%p2347_p1), [#allocation6], 2048  }
  0x82   : > { %1954 = vsyncadd (%p2347_p1), [#allocation6], 4294965248 }
  0x83   : > { %1956 = dma.done.wait (%p2347_p1), [#allocation9], 4096  }
  0x84   : > { %1958 = vsyncadd (%p2347_p1), [#allocation9], 4294963200 }
  0x85   : > { %1960 = dma.done.wait (%p2347_p1), [#allocation12], 2048  }
  0x86   : > { %1962 = vsyncadd (%p2347_p1), [#allocation12], 4294965248  ;;  %s318_s11 = sand.u32 1, %s1973_s22   ;;  %p1266_p13 = scmp.ne.s32.totalorder %s1981_s24, 0 }
  0x87   : > { %s1265_s15 = sshll.u32 %s318_s11, 7  ;;  %v349_v0 = vld [vmem:[#allocation10] sm:$0xff] (!%p1266_p13)  ;;  %v350_v1 = vld [vmem:[#allocation10 + $0x8] sm:$0xff] (!%p1266_p13)  ;;  %v351_v2 = vld [vmem:[#allocation10 + $0x10] sm:$0xff] (!%p1266_p13) }
  0x88   : > { %s2213_s30 = scalar_lea.vmem [#allocation13], %s1265_s15  ;;  %332 = sbr.rel (%p1266_p13) target bundleno = 396 (0x18c), region = 68  ;;  %v1542_v3 = vpack.c.bf16 (!%p1266_p13), %v350_v1, %v349_v0  ;;  %v352_v4 = vld [vmem:[#allocation10 + $0x18] sm:$0xff] (!%p1266_p13)  ;;  %v353_v6 = vld [vmem:[#allocation10 + $0x20] sm:$0xff] (!%p1266_p13)  ;;  %v354_v7 = vld [vmem:[#allocation10 + $0x28] sm:$0xff] (!%p1266_p13) }
  0x89   : > { %v1546_v5 = vpack.c.bf16 (!%p1266_p13), %v352_v4, %v351_v2  ;;  %v1550_v8 = vpack.c.bf16 (!%p1266_p13), %v354_v7, %v353_v6  ;;  %v333_v9 = vld [vmem:[#allocation5] sm:$0xff] (!%p1266_p13)  ;;  %v355_v11 = vld [vmem:[#allocation10 + $0x30] sm:$0xff] (!%p1266_p13)  ;;  %v356_v12 = vld [vmem:[#allocation10 + $0x38] sm:$0xff] (!%p1266_p13) }
  0x8a   : > { %1543 = vmatprep.subr.bf16.mxu0 (!%p1266_p13), %v1542_v3  ;;  %1638 = vmatprep.subr.bf16.mxu1 (!%p1266_p13), %v1542_v3  ;;  %v341_v10 = vld [vmem:[#allocation5 + $0x40] sm:$0xff] (!%p1266_p13)  ;;  %v1554_v13 = vpack.c.bf16 (!%p1266_p13), %v356_v12, %v355_v11  ;;  %v358_v15 = vld [vmem:[#allocation10 + $0x48] sm:$0xff] (!%p1266_p13)  ;;  %v359_v17 = vld [vmem:[#allocation10 + $0x50] sm:$0xff] (!%p1266_p13) }
  0x8b   : > { %1545 = vmatpush3.bf16.msra.mxu0 (!%p1266_p13), %v1542_v3  ;;  %1646 = vmatpush3.bf16.msra.mxu1 (!%p1266_p13), %v1542_v3  ;;  %v357_v14 = vld [vmem:[#allocation10 + $0x40] sm:$0xff] (!%p1266_p13)  ;;  %v360_v18 = vld [vmem:[#allocation10 + $0x58] sm:$0xff] (!%p1266_p13)  ;;  %v362_v21 = vld [vmem:[#allocation10 + $0x68] sm:$0xff] (!%p1266_p13) }
  0x8c   : > { %1547 = vmatprep.subr.bf16.mxu0 (!%p1266_p13), %v1546_v5  ;;  %1639 = vmatprep.subr.bf16.mxu1 (!%p1266_p13), %v1546_v5  ;;  %v1558_v16 = vpack.c.bf16 (!%p1266_p13), %v358_v15, %v357_v14  ;;  %v1562_v19 = vpack.c.bf16 (!%p1266_p13), %v360_v18, %v359_v17  ;;  %v361_v20 = vld [vmem:[#allocation10 + $0x60] sm:$0xff] (!%p1266_p13)  ;;  %v363_v23 = vld [vmem:[#allocation10 + $0x70] sm:$0xff] (!%p1266_p13)  ;;  %v364_v24 = vld [vmem:[#allocation10 + $0x78] sm:$0xff] (!%p1266_p13) }
  0x8d   : > { %1406 = vmatprep.mubr.f32.mxu0 (!%p1266_p13), %v333_v9  ;;  %1418 = vmatprep.mubr.f32.mxu1 (!%p1266_p13), %v341_v10  ;;  %v1566_v22 = vpack.c.bf16 (!%p1266_p13), %v362_v21, %v361_v20  ;;  %v1570_v25 = vpack.c.bf16 (!%p1266_p13), %v364_v24, %v363_v23  ;;  %v334_v26 = vld [vmem:[#allocation5 + $0x8] sm:$0xff] (!%p1266_p13)  ;;  %v335_v28 = vld [vmem:[#allocation5 + $0x10] sm:$0xff] (!%p1266_p13)  ;;  %v336_v30 = vld [vmem:[#allocation5 + $0x18] sm:$0xff] (!%p1266_p13) }
  0x8e   : > { %v342_v27 = vld [vmem:[#allocation5 + $0x48] sm:$0xff] (!%p1266_p13)  ;;  %v343_v29 = vld [vmem:[#allocation5 + $0x50] sm:$0xff] (!%p1266_p13)  ;;  %v344_v31 = vld [vmem:[#allocation5 + $0x58] sm:$0xff] (!%p1266_p13) }
  0x8f   : > { %1549 = vmatpush3.bf16.msra.mxu0 %v1546_v5  ;;  %1647 = vmatpush3.bf16.msra.mxu1 %v1546_v5  ;;  %v337_v32 = vld [vmem:[#allocation5 + $0x20] sm:$0xff]  ;;  %v338_v34 = vld [vmem:[#allocation5 + $0x28] sm:$0xff]  ;;  %v339_v36 = vld [vmem:[#allocation5 + $0x30] sm:$0xff] }
  0x90   : > { %1551 = vmatprep.subr.bf16.mxu0 %v1550_v8  ;;  %1640 = vmatprep.subr.bf16.mxu1 %v1550_v8  ;;  %v345_v33 = vld [vmem:[#allocation5 + $0x60] sm:$0xff]  ;;  %v346_v35 = vld [vmem:[#allocation5 + $0x68] sm:$0xff]  ;;  %v347_v37 = vld [vmem:[#allocation5 + $0x70] sm:$0xff] }
  0x91   : > { %v340_v38 = vld [vmem:[#allocation5 + $0x38] sm:$0xff] }
  0x92   : > { %v348_v39 = vld [vmem:[#allocation5 + $0x78] sm:$0xff] }
  0x93   : > { %1553 = vmatpush3.bf16.msra.mxu0 %v1550_v8  ;;  %1648 = vmatpush3.bf16.msra.mxu1 %v1550_v8 }
  0x94   : > { %1555 = vmatprep.subr.bf16.mxu0 %v1554_v13  ;;  %1641 = vmatprep.subr.bf16.mxu1 %v1554_v13 }
  0x97   : > { %1557 = vmatpush3.bf16.msra.mxu0 %v1554_v13  ;;  %1649 = vmatpush3.bf16.msra.mxu1 %v1554_v13 }
  0x98   : > { %1559 = vmatprep.subr.bf16.mxu0 %v1558_v16  ;;  %1642 = vmatprep.subr.bf16.mxu1 %v1558_v16 }
  0x9b   : > { %1561 = vmatpush3.bf16.msra.mxu0 %v1558_v16  ;;  %1650 = vmatpush3.bf16.msra.mxu1 %v1558_v16 }
  0x9c   : > { %1563 = vmatprep.subr.bf16.mxu0 %v1562_v19  ;;  %1643 = vmatprep.subr.bf16.mxu1 %v1562_v19 }
  0x9f   : > { %1565 = vmatpush3.bf16.msra.mxu0 %v1562_v19  ;;  %1651 = vmatpush3.bf16.msra.mxu1 %v1562_v19 }
  0xa0   : > { %1567 = vmatprep.subr.bf16.mxu0 %v1566_v22  ;;  %1644 = vmatprep.subr.bf16.mxu1 %v1566_v22 }
  0xa3   : > { %1569 = vmatpush3.bf16.msra.mxu0 %v1566_v22  ;;  %1652 = vmatpush3.bf16.msra.mxu1 %v1566_v22 }
  0xa4   : > { %1571 = vmatprep.subr.bf16.mxu0 %v1570_v25  ;;  %1645 = vmatprep.subr.bf16.mxu1 %v1570_v25 }
  0xa7   : > { %1573 = vmatpush3.bf16.msra.mxu0 %v1570_v25  ;;  %1653 = vmatpush3.bf16.msra.mxu1 %v1570_v25 }
  0xaa   : > { %1407 = vmatmul.mubr.f32.vlgmr.msra.gmra.mrb[0].mxu0 %v334_v26  ;;  %1419 = vmatmul.mubr.f32.vlgmr.msra.gmra.mrb[0].mxu1 %v342_v27 }
  0xab   : > { %1409 = vmatprep.mubr.f32.mxu0 %v335_v28  ;;  %1421 = vmatprep.mubr.f32.mxu1 %v343_v29 }
  0xae   : > { %1410 = vmatmul.mubr.f32.gmra.mrb[2].mxu0 %v336_v30  ;;  %1422 = vmatmul.mubr.f32.gmra.mrb[2].mxu1 %v344_v31 }
  0xaf   : > { %1412 = vmatprep.mubr.f32.mxu0 %v337_v32  ;;  %1424 = vmatprep.mubr.f32.mxu1 %v345_v33 }
  0xb2   : > { %1413 = vmatmul.mubr.f32.gmra.mrb[4].mxu0 %v338_v34  ;;  %1425 = vmatmul.mubr.f32.gmra.mrb[4].mxu1 %v346_v35 }
  0xb3   : > { %1415 = vmatprep.mubr.f32.mxu0 %v339_v36  ;;  %1427 = vmatprep.mubr.f32.mxu1 %v347_v37 }
  0xb6   : > { %1416 = vmatmul.mubr.f32.gmra.mrb[6].mxu0 %v340_v38  ;;  %1428 = vmatmul.mubr.f32.gmra.mrb[6].mxu1 %v348_v39 }
 0x17d   : > { %v1408_v40 = vpop.f32.mrb[0].mxu0  ;;  %v1420_v41 = vpop.f32.mrb[0].mxu1 }
 0x17e   : > { %511 = vst [vmem:[#allocation2 + $0x8] sm:$0xff] %v1408_v40  ;;  %519 = vst [vmem:[#allocation2 + $0x48] sm:$0xff] %v1420_v41  ;;  %v431_v42 = vpop.f32.mrb[1].mxu0  ;;  %v471_v43 = vpop.f32.mrb[1].mxu1 }
 0x17f   : > { %510 = vst [vmem:[#allocation2] sm:$0xff] %v431_v42  ;;  %518 = vst [vmem:[#allocation2 + $0x40] sm:$0xff] %v471_v43 }
 0x181   : > { %v1411_v44 = vpop.f32.mrb[2].mxu0  ;;  %v1423_v45 = vpop.f32.mrb[2].mxu1 }
 0x182   : > { %513 = vst [vmem:[#allocation2 + $0x18] sm:$0xff] %v1411_v44  ;;  %521 = vst [vmem:[#allocation2 + $0x58] sm:$0xff] %v1423_v45  ;;  %v441_v46 = vpop.f32.mrb[3].mxu0  ;;  %v481_v47 = vpop.f32.mrb[3].mxu1 }
 0x183   : > { %512 = vst [vmem:[#allocation2 + $0x10] sm:$0xff] %v441_v46  ;;  %520 = vst [vmem:[#allocation2 + $0x50] sm:$0xff] %v481_v47 }
 0x185   : > { %v1414_v48 = vpop.f32.mrb[4].mxu0  ;;  %v1426_v49 = vpop.f32.mrb[4].mxu1 }
 0x186   : > { %515 = vst [vmem:[#allocation2 + $0x28] sm:$0xff] %v1414_v48  ;;  %523 = vst [vmem:[#allocation2 + $0x68] sm:$0xff] %v1426_v49  ;;  %v451_v50 = vpop.f32.mrb[5].mxu0  ;;  %v491_v51 = vpop.f32.mrb[5].mxu1 }
 0x187   : > { %514 = vst [vmem:[#allocation2 + $0x20] sm:$0xff] %v451_v50  ;;  %522 = vst [vmem:[#allocation2 + $0x60] sm:$0xff] %v491_v51 }
 0x189   : > { %v1417_v52 = vpop.f32.mrb[6].mxu0  ;;  %v1429_v53 = vpop.f32.mrb[6].mxu1 }
 0x18a   : > { %517 = vst [vmem:[#allocation2 + $0x38] sm:$0xff] %v1417_v52  ;;  %525 = vst [vmem:[#allocation2 + $0x78] sm:$0xff] %v1429_v53  ;;  %v461_v54 = vpop.f32.mrb[7].mxu0  ;;  %v501_v55 = vpop.f32.mrb[7].mxu1 }
 0x18b   : > { %516 = vst [vmem:[#allocation2 + $0x30] sm:$0xff] %v461_v54  ;;  %524 = vst [vmem:[#allocation2 + $0x70] sm:$0xff] %v501_v55 }
 0x18c PF: > { %p1267_p8 = scmp.ne.s32.totalorder %s1981_s24, 1 }
 0x18d   : > { %v546_v56 = vld [vmem:[#allocation11] sm:$0xff] (!%p1267_p8)  ;;  %v547_v57 = vld [vmem:[#allocation11 + $0x8] sm:$0xff] (!%p1267_p8)  ;;  %v548_v58 = vld [vmem:[#allocation11 + $0x10] sm:$0xff] (!%p1267_p8) }
 0x18e   : > { %529 = sbr.rel (%p1267_p8) target bundleno = 658 (0x292), region = 72  ;;  %v1574_v59 = vpack.c.bf16 (!%p1267_p8), %v547_v57, %v546_v56  ;;  %v549_v60 = vld [vmem:[#allocation11 + $0x18] sm:$0xff] (!%p1267_p8)  ;;  %v550_v62 = vld [vmem:[#allocation11 + $0x20] sm:$0xff] (!%p1267_p8)  ;;  %v551_v63 = vld [vmem:[#allocation11 + $0x28] sm:$0xff] (!%p1267_p8) }
 0x18f   : > { %v1578_v61 = vpack.c.bf16 (!%p1267_p8), %v549_v60, %v548_v58  ;;  %v1582_v0 = vpack.c.bf16 (!%p1267_p8), %v551_v63, %v550_v62  ;;  %v530_v1 = vld [vmem:[#allocation3] sm:$0xff] (!%p1267_p8)  ;;  %v552_v3 = vld [vmem:[#allocation11 + $0x30] sm:$0xff] (!%p1267_p8)  ;;  %v553_v4 = vld [vmem:[#allocation11 + $0x38] sm:$0xff] (!%p1267_p8) }
 0x190   : > { %1575 = vmatprep.subr.bf16.mxu0 (!%p1267_p8), %v1574_v59  ;;  %1654 = vmatprep.subr.bf16.mxu1 (!%p1267_p8), %v1574_v59  ;;  %v538_v2 = vld [vmem:[#allocation3 + $0x40] sm:$0xff] (!%p1267_p8)  ;;  %v1586_v5 = vpack.c.bf16 (!%p1267_p8), %v553_v4, %v552_v3  ;;  %v555_v7 = vld [vmem:[#allocation11 + $0x48] sm:$0xff] (!%p1267_p8)  ;;  %v556_v9 = vld [vmem:[#allocation11 + $0x50] sm:$0xff] (!%p1267_p8) }
 0x191   : > { %1577 = vmatpush3.bf16.msra.mxu0 (!%p1267_p8), %v1574_v59  ;;  %1662 = vmatpush3.bf16.msra.mxu1 (!%p1267_p8), %v1574_v59  ;;  %v554_v6 = vld [vmem:[#allocation11 + $0x40] sm:$0xff] (!%p1267_p8)  ;;  %v557_v10 = vld [vmem:[#allocation11 + $0x58] sm:$0xff] (!%p1267_p8)  ;;  %v559_v13 = vld [vmem:[#allocation11 + $0x68] sm:$0xff] (!%p1267_p8) }
 0x192   : > { %1579 = vmatprep.subr.bf16.mxu0 (!%p1267_p8), %v1578_v61  ;;  %1655 = vmatprep.subr.bf16.mxu1 (!%p1267_p8), %v1578_v61  ;;  %v1590_v8 = vpack.c.bf16 (!%p1267_p8), %v555_v7, %v554_v6  ;;  %v1594_v11 = vpack.c.bf16 (!%p1267_p8), %v557_v10, %v556_v9  ;;  %v558_v12 = vld [vmem:[#allocation11 + $0x60] sm:$0xff] (!%p1267_p8)  ;;  %v560_v15 = vld [vmem:[#allocation11 + $0x70] sm:$0xff] (!%p1267_p8)  ;;  %v561_v16 = vld [vmem:[#allocation11 + $0x78] sm:$0xff] (!%p1267_p8) }
 0x193   : > { %1462 = vmatprep.mubr.f32.mxu0 (!%p1267_p8), %v530_v1  ;;  %1474 = vmatprep.mubr.f32.mxu1 (!%p1267_p8), %v538_v2  ;;  %v1598_v14 = vpack.c.bf16 (!%p1267_p8), %v559_v13, %v558_v12  ;;  %v1602_v17 = vpack.c.bf16 (!%p1267_p8), %v561_v16, %v560_v15  ;;  %v531_v18 = vld [vmem:[#allocation3 + $0x8] sm:$0xff] (!%p1267_p8)  ;;  %v532_v20 = vld [vmem:[#allocation3 + $0x10] sm:$0xff] (!%p1267_p8)  ;;  %v533_v22 = vld [vmem:[#allocation3 + $0x18] sm:$0xff] (!%p1267_p8) }
 0x194   : > { %v539_v19 = vld [vmem:[#allocation3 + $0x48] sm:$0xff] (!%p1267_p8)  ;;  %v540_v21 = vld [vmem:[#allocation3 + $0x50] sm:$0xff] (!%p1267_p8)  ;;  %v541_v23 = vld [vmem:[#allocation3 + $0x58] sm:$0xff] (!%p1267_p8) }
 0x195   : > { %1581 = vmatpush3.bf16.msra.mxu0 %v1578_v61  ;;  %1663 = vmatpush3.bf16.msra.mxu1 %v1578_v61  ;;  %v534_v24 = vld [vmem:[#allocation3 + $0x20] sm:$0xff]  ;;  %v535_v26 = vld [vmem:[#allocation3 + $0x28] sm:$0xff]  ;;  %v536_v28 = vld [vmem:[#allocation3 + $0x30] sm:$0xff] }
 0x196   : > { %1583 = vmatprep.subr.bf16.mxu0 %v1582_v0  ;;  %1656 = vmatprep.subr.bf16.mxu1 %v1582_v0  ;;  %v542_v25 = vld [vmem:[#allocation3 + $0x60] sm:$0xff]  ;;  %v543_v27 = vld [vmem:[#allocation3 + $0x68] sm:$0xff]  ;;  %v544_v29 = vld [vmem:[#allocation3 + $0x70] sm:$0xff] }
 0x197   : > { %v537_v30 = vld [vmem:[#allocation3 + $0x38] sm:$0xff] }
 0x198   : > { %v545_v31 = vld [vmem:[#allocation3 + $0x78] sm:$0xff] }
 0x199   : > { %1585 = vmatpush3.bf16.msra.mxu0 %v1582_v0  ;;  %1664 = vmatpush3.bf16.msra.mxu1 %v1582_v0 }
 0x19a   : > { %1587 = vmatprep.subr.bf16.mxu0 %v1586_v5  ;;  %1657 = vmatprep.subr.bf16.mxu1 %v1586_v5 }
 0x19d   : > { %1589 = vmatpush3.bf16.msra.mxu0 %v1586_v5  ;;  %1665 = vmatpush3.bf16.msra.mxu1 %v1586_v5 }
 0x19e   : > { %1591 = vmatprep.subr.bf16.mxu0 %v1590_v8  ;;  %1658 = vmatprep.subr.bf16.mxu1 %v1590_v8 }
 0x1a1   : > { %1593 = vmatpush3.bf16.msra.mxu0 %v1590_v8  ;;  %1666 = vmatpush3.bf16.msra.mxu1 %v1590_v8 }
 0x1a2   : > { %1595 = vmatprep.subr.bf16.mxu0 %v1594_v11  ;;  %1659 = vmatprep.subr.bf16.mxu1 %v1594_v11 }
 0x1a5   : > { %1597 = vmatpush3.bf16.msra.mxu0 %v1594_v11  ;;  %1667 = vmatpush3.bf16.msra.mxu1 %v1594_v11 }
 0x1a6   : > { %1599 = vmatprep.subr.bf16.mxu0 %v1598_v14  ;;  %1660 = vmatprep.subr.bf16.mxu1 %v1598_v14 }
 0x1a9   : > { %1601 = vmatpush3.bf16.msra.mxu0 %v1598_v14  ;;  %1668 = vmatpush3.bf16.msra.mxu1 %v1598_v14 }
 0x1aa   : > { %1603 = vmatprep.subr.bf16.mxu0 %v1602_v17  ;;  %1661 = vmatprep.subr.bf16.mxu1 %v1602_v17 }
 0x1ad   : > { %1605 = vmatpush3.bf16.msra.mxu0 %v1602_v17  ;;  %1669 = vmatpush3.bf16.msra.mxu1 %v1602_v17 }
 0x1b0   : > { %1463 = vmatmul.mubr.f32.vlgmr.msra.gmra.mrb[0].mxu0 %v531_v18  ;;  %1475 = vmatmul.mubr.f32.vlgmr.msra.gmra.mrb[0].mxu1 %v539_v19 }
 0x1b1   : > { %1465 = vmatprep.mubr.f32.mxu0 %v532_v20  ;;  %1477 = vmatprep.mubr.f32.mxu1 %v540_v21 }
 0x1b4   : > { %1466 = vmatmul.mubr.f32.gmra.mrb[2].mxu0 %v533_v22  ;;  %1478 = vmatmul.mubr.f32.gmra.mrb[2].mxu1 %v541_v23 }
 0x1b5   : > { %1468 = vmatprep.mubr.f32.mxu0 %v534_v24  ;;  %1480 = vmatprep.mubr.f32.mxu1 %v542_v25 }
 0x1b8   : > { %1469 = vmatmul.mubr.f32.gmra.mrb[4].mxu0 %v535_v26  ;;  %1481 = vmatmul.mubr.f32.gmra.mrb[4].mxu1 %v543_v27 }
 0x1b9   : > { %1471 = vmatprep.mubr.f32.mxu0 %v536_v28  ;;  %1483 = vmatprep.mubr.f32.mxu1 %v544_v29 }
 0x1bc   : > { %1472 = vmatmul.mubr.f32.gmra.mrb[6].mxu0 %v537_v30  ;;  %1484 = vmatmul.mubr.f32.gmra.mrb[6].mxu1 %v545_v31 }
 0x283   : > { %v1464_v32 = vpop.f32.mrb[0].mxu0  ;;  %v1476_v33 = vpop.f32.mrb[0].mxu1 }
 0x284   : > { %708 = vst [vmem:[#allocation2 + $0x8] sm:$0xff] %v1464_v32  ;;  %716 = vst [vmem:[#allocation2 + $0x48] sm:$0xff] %v1476_v33  ;;  %v628_v34 = vpop.f32.mrb[1].mxu0  ;;  %v668_v35 = vpop.f32.mrb[1].mxu1 }
 0x285   : > { %707 = vst [vmem:[#allocation2] sm:$0xff] %v628_v34  ;;  %715 = vst [vmem:[#allocation2 + $0x40] sm:$0xff] %v668_v35 }
 0x287   : > { %v1467_v36 = vpop.f32.mrb[2].mxu0  ;;  %v1479_v37 = vpop.f32.mrb[2].mxu1 }
 0x288   : > { %710 = vst [vmem:[#allocation2 + $0x18] sm:$0xff] %v1467_v36  ;;  %718 = vst [vmem:[#allocation2 + $0x58] sm:$0xff] %v1479_v37  ;;  %v638_v38 = vpop.f32.mrb[3].mxu0  ;;  %v678_v39 = vpop.f32.mrb[3].mxu1 }
 0x289   : > { %709 = vst [vmem:[#allocation2 + $0x10] sm:$0xff] %v638_v38  ;;  %717 = vst [vmem:[#allocation2 + $0x50] sm:$0xff] %v678_v39 }
 0x28b   : > { %v1470_v40 = vpop.f32.mrb[4].mxu0  ;;  %v1482_v41 = vpop.f32.mrb[4].mxu1 }
 0x28c   : > { %712 = vst [vmem:[#allocation2 + $0x28] sm:$0xff] %v1470_v40  ;;  %720 = vst [vmem:[#allocation2 + $0x68] sm:$0xff] %v1482_v41  ;;  %v648_v42 = vpop.f32.mrb[5].mxu0  ;;  %v688_v43 = vpop.f32.mrb[5].mxu1 }
 0x28d   : > { %711 = vst [vmem:[#allocation2 + $0x20] sm:$0xff] %v648_v42  ;;  %719 = vst [vmem:[#allocation2 + $0x60] sm:$0xff] %v688_v43 }
 0x28f   : > { %v1473_v44 = vpop.f32.mrb[6].mxu0  ;;  %v1485_v45 = vpop.f32.mrb[6].mxu1 }
 0x290   : > { %714 = vst [vmem:[#allocation2 + $0x38] sm:$0xff] %v1473_v44  ;;  %722 = vst [vmem:[#allocation2 + $0x78] sm:$0xff] %v1485_v45  ;;  %v658_v46 = vpop.f32.mrb[7].mxu0  ;;  %v698_v47 = vpop.f32.mrb[7].mxu1 }
 0x291   : > { %713 = vst [vmem:[#allocation2 + $0x30] sm:$0xff] %v658_v46  ;;  %721 = vst [vmem:[#allocation2 + $0x70] sm:$0xff] %v698_v47 }
 0x292 PF: > { %v776_v48 = vld [vmem:[#allocation2] sm:$0xff]  ;;  %v777_v49 = vld [vmem:[#allocation2 + $0x8] sm:$0xff]  ;;  %v778_v50 = vld [vmem:[#allocation2 + $0x10] sm:$0xff] }
 0x293   : > { %v1606_v51 = vpack.c.bf16 %v777_v49, %v776_v48  ;;  %v779_v52 = vld [vmem:[#allocation2 + $0x18] sm:$0xff]  ;;  %v781_v55 = vld [vmem:[#allocation2 + $0x28] sm:$0xff]  ;;  %v759_v57 = vld [vmem:[#allocation8] sm:$0xff] }
 0x294   : > { %v1610_v53 = vpack.c.bf16 %v779_v52, %v778_v50  ;;  %v780_v54 = vld [vmem:[#allocation2 + $0x20] sm:$0xff]  ;;  %1518 = vmatprep.mubr.f32.mxu0 %v759_v57  ;;  %v785_v63 = vld [vmem:[#allocation2 + $0x48] sm:$0xff]  ;;  %v786_v1 = vld [vmem:[#allocation2 + $0x50] sm:$0xff] }
 0x295   : > { %1607 = vmatprep.subr.bf16.mxu0 %v1606_v51  ;;  %1670 = vmatprep.subr.bf16.mxu1 %v1606_v51  ;;  %v1614_v56 = vpack.c.bf16 %v781_v55, %v780_v54  ;;  %v767_v58 = vld [vmem:[#allocation8 + $0x40] sm:$0xff]  ;;  %v787_v2 = vld [vmem:[#allocation2 + $0x58] sm:$0xff]  ;;  %v789_v5 = vld [vmem:[#allocation2 + $0x68] sm:$0xff] }
 0x296   : > { %1609 = vmatpush3.bf16.msra.mxu0 %v1606_v51  ;;  %1678 = vmatpush3.bf16.msra.mxu1 %v1606_v51  ;;  %v784_v62 = vld [vmem:[#allocation2 + $0x40] sm:$0xff]  ;;  %v1626_v3 = vpack.c.bf16 %v787_v2, %v786_v1  ;;  %v760_v10 = vld [vmem:[#allocation8 + $0x8] sm:$0xff]  ;;  %v761_v12 = vld [vmem:[#allocation8 + $0x10] sm:$0xff] }
 0x297   : > { %1611 = vmatprep.subr.bf16.mxu0 %v1610_v53  ;;  %1671 = vmatprep.subr.bf16.mxu1 %v1610_v53  ;;  %v783_v60 = vld [vmem:[#allocation2 + $0x38] sm:$0xff]  ;;  %v1622_v0 = vpack.c.bf16 %v785_v63, %v784_v62  ;;  %v788_v4 = vld [vmem:[#allocation2 + $0x60] sm:$0xff]  ;;  %v768_v11 = vld [vmem:[#allocation8 + $0x48] sm:$0xff] }
 0x298   : > { %v782_v59 = vld [vmem:[#allocation2 + $0x30] sm:$0xff]  ;;  %1530 = vmatprep.mubr.f32.mxu1 %v767_v58  ;;  %v1630_v6 = vpack.c.bf16 %v789_v5, %v788_v4  ;;  %v791_v8 = vld [vmem:[#allocation2 + $0x78] sm:$0xff]  ;;  %v763_v16 = vld [vmem:[#allocation8 + $0x20] sm:$0xff] }
 0x299   : > { %v1618_v61 = vpack.c.bf16 %v783_v60, %v782_v59  ;;  %v790_v7 = vld [vmem:[#allocation2 + $0x70] sm:$0xff]  ;;  %v762_v14 = vld [vmem:[#allocation8 + $0x18] sm:$0xff]  ;;  %v771_v17 = vld [vmem:[#allocation8 + $0x60] sm:$0xff] }
 0x29a   : > { %1613 = vmatpush3.bf16.msra.mxu0 %v1610_v53  ;;  %1679 = vmatpush3.bf16.msra.mxu1 %v1610_v53  ;;  %v1634_v9 = vpack.c.bf16 %v791_v8, %v790_v7  ;;  %v769_v13 = vld [vmem:[#allocation8 + $0x50] sm:$0xff]  ;;  %v770_v15 = vld [vmem:[#allocation8 + $0x58] sm:$0xff]  ;;  %v764_v18 = vld [vmem:[#allocation8 + $0x28] sm:$0xff] }
 0x29b   : > { %1615 = vmatprep.subr.bf16.mxu0 %v1614_v56  ;;  %1672 = vmatprep.subr.bf16.mxu1 %v1614_v56  ;;  %v772_v19 = vld [vmem:[#allocation8 + $0x68] sm:$0xff]  ;;  %v765_v20 = vld [vmem:[#allocation8 + $0x30] sm:$0xff]  ;;  %v766_v22 = vld [vmem:[#allocation8 + $0x38] sm:$0xff] }
 0x29c   : > { %v773_v21 = vld [vmem:[#allocation8 + $0x70] sm:$0xff]  ;;  %v774_v23 = vld [vmem:[#allocation8 + $0x78] sm:$0xff]  ;;  %v1269_v41 = vld [vmem:[%s2323_s3] ss:$0 sm:$0xff] (!%p1266_p13) }
 0x29e   : > { %1617 = vmatpush3.bf16.msra.mxu0 %v1614_v56  ;;  %1680 = vmatpush3.bf16.msra.mxu1 %v1614_v56 }
 0x29f   : > { %1619 = vmatprep.subr.bf16.mxu0 %v1618_v61  ;;  %1673 = vmatprep.subr.bf16.mxu1 %v1618_v61 }
 0x2a2   : > { %1621 = vmatpush3.bf16.msra.mxu0 %v1618_v61  ;;  %1681 = vmatpush3.bf16.msra.mxu1 %v1618_v61 }
 0x2a3   : > { %1623 = vmatprep.subr.bf16.mxu0 %v1622_v0  ;;  %1674 = vmatprep.subr.bf16.mxu1 %v1622_v0 }
 0x2a6   : > { %1625 = vmatpush3.bf16.msra.mxu0 %v1622_v0  ;;  %1682 = vmatpush3.bf16.msra.mxu1 %v1622_v0 }
 0x2a7   : > { %1627 = vmatprep.subr.bf16.mxu0 %v1626_v3  ;;  %1675 = vmatprep.subr.bf16.mxu1 %v1626_v3 }
 0x2aa   : > { %1629 = vmatpush3.bf16.msra.mxu0 %v1626_v3  ;;  %1683 = vmatpush3.bf16.msra.mxu1 %v1626_v3 }
 0x2ab   : > { %1631 = vmatprep.subr.bf16.mxu0 %v1630_v6  ;;  %1676 = vmatprep.subr.bf16.mxu1 %v1630_v6 }
 0x2ae   : > { %1633 = vmatpush3.bf16.msra.mxu0 %v1630_v6  ;;  %1684 = vmatpush3.bf16.msra.mxu1 %v1630_v6 }
 0x2af   : > { %1635 = vmatprep.subr.bf16.mxu0 %v1634_v9  ;;  %1677 = vmatprep.subr.bf16.mxu1 %v1634_v9 }
 0x2b2   : > { %1637 = vmatpush3.bf16.msra.mxu0 %v1634_v9  ;;  %1685 = vmatpush3.bf16.msra.mxu1 %v1634_v9 }
 0x2b5   : > { %1519 = vmatmul.mubr.f32.vlgmr.msra.gmra.mrb[0].mxu0 %v760_v10  ;;  %1531 = vmatmul.mubr.f32.vlgmr.msra.gmra.mrb[0].mxu1 %v768_v11 }
 0x2b6   : > { %1521 = vmatprep.mubr.f32.mxu0 %v761_v12  ;;  %1533 = vmatprep.mubr.f32.mxu1 %v769_v13 }
 0x2b9   : > { %1522 = vmatmul.mubr.f32.gmra.mrb[2].mxu0 %v762_v14  ;;  %1534 = vmatmul.mubr.f32.gmra.mrb[2].mxu1 %v770_v15 }
 0x2ba   : > { %1524 = vmatprep.mubr.f32.mxu0 %v763_v16  ;;  %1536 = vmatprep.mubr.f32.mxu1 %v771_v17 }
 0x2bd   : > { %1525 = vmatmul.mubr.f32.gmra.mrb[4].mxu0 %v764_v18  ;;  %1537 = vmatmul.mubr.f32.gmra.mrb[4].mxu1 %v772_v19 }
 0x2be   : > { %1527 = vmatprep.mubr.f32.mxu0 %v765_v20  ;;  %1539 = vmatprep.mubr.f32.mxu1 %v773_v21 }
 0x2c1   : > { %1528 = vmatmul.mubr.f32.gmra.mrb[6].mxu0 %v766_v22  ;;  %1540 = vmatmul.mubr.f32.gmra.mrb[6].mxu1 %v774_v23 }
 0x388   : > { %v1520_v24 = vpop.f32.mrb[0].mxu0  ;;  %v1532_v25 = vpop.f32.mrb[0].mxu1 }
 0x389   : > { %v858_v26 = vpop.f32.mrb[1].mxu0  ;;  %v898_v27 = vpop.f32.mrb[1].mxu1  ;;  %954 = vst [vmem:[#allocation4 + $0x8] sm:$0xff] %v1520_v24  ;;  %962 = vst [vmem:[#allocation4 + $0x48] sm:$0xff] %v1532_v25 }
 0x38a   : > { %953 = vst [vmem:[#allocation4] sm:$0xff] %v858_v26  ;;  %961 = vst [vmem:[#allocation4 + $0x40] sm:$0xff] %v898_v27 }
 0x38c   : > { %v1523_v28 = vpop.f32.mrb[2].mxu0  ;;  %v1535_v29 = vpop.f32.mrb[2].mxu1 }
 0x38d   : > { %v868_v30 = vpop.f32.mrb[3].mxu0  ;;  %v908_v31 = vpop.f32.mrb[3].mxu1  ;;  %956 = vst [vmem:[#allocation4 + $0x18] sm:$0xff] %v1523_v28  ;;  %964 = vst [vmem:[#allocation4 + $0x58] sm:$0xff] %v1535_v29 }
 0x38e   : > { %955 = vst [vmem:[#allocation4 + $0x10] sm:$0xff] %v868_v30  ;;  %963 = vst [vmem:[#allocation4 + $0x50] sm:$0xff] %v908_v31 }
 0x390   : > { %v1526_v32 = vpop.f32.mrb[4].mxu0  ;;  %v1538_v33 = vpop.f32.mrb[4].mxu1  ;;  %975 = sbr.rel (%p1266_p13) target bundleno = 935 (0x3a7), region = 84  ;;  %v977_v42 = vld [vmem:[#allocation4 + $0x8] sm:$0xff] (!%p1266_p13) }
 0x391   : > { %v878_v34 = vpop.f32.mrb[5].mxu0  ;;  %v918_v35 = vpop.f32.mrb[5].mxu1  ;;  %958 = vst [vmem:[#allocation4 + $0x28] sm:$0xff] %v1526_v32  ;;  %966 = vst [vmem:[#allocation4 + $0x68] sm:$0xff] %v1538_v33  ;;  %v976_v40 = vld [vmem:[#allocation4] sm:$0xff] (!%p1266_p13)  ;;  %v1000_v44 = vadd.f32 (!%p1266_p13), %v1269_v41, %v977_v42  ;;  %v985_v59 = vld [vmem:[#allocation4 + $0x48] sm:$0xff] (!%p1266_p13) }
 0x392   : > { %957 = vst [vmem:[#allocation4 + $0x20] sm:$0xff] %v878_v34  ;;  %965 = vst [vmem:[#allocation4 + $0x60] sm:$0xff] %v918_v35  ;;  %v999_v43 = vadd.f32 (!%p1266_p13), %v1269_v41, %v976_v40  ;;  %v984_v58 = vld [vmem:[#allocation4 + $0x40] sm:$0xff] (!%p1266_p13)  ;;  %v1008_v7 = vadd.f32 (!%p1266_p13), %v1269_v41, %v985_v59 }
 0x393   : > { %v1016_v55 = vmax.f32 (!%p1266_p13), %v1000_v44, 0.0  ;;  %v1007_v6 = vadd.f32 (!%p1266_p13), %v1269_v41, %v984_v58 }
 0x394   : > { %v1529_v36 = vpop.f32.mrb[6].mxu0  ;;  %v1541_v37 = vpop.f32.mrb[6].mxu1  ;;  %v979_v46 = vld [vmem:[#allocation4 + $0x18] sm:$0xff] (!%p1266_p13)  ;;  %v1015_v54 = vmax.f32 (!%p1266_p13), %v999_v43, 0.0  ;;  %v1024_v15 = vmax.f32 (!%p1266_p13), %v1008_v7, 0.0 }
 0x395   : > { %v888_v38 = vpop.f32.mrb[7].mxu0  ;;  %v928_v39 = vpop.f32.mrb[7].mxu1  ;;  %960 = vst [vmem:[#allocation4 + $0x38] sm:$0xff] %v1529_v36  ;;  %968 = vst [vmem:[#allocation4 + $0x78] sm:$0xff] %v1541_v37  ;;  %v978_v45 = vld [vmem:[#allocation4 + $0x10] sm:$0xff] (!%p1266_p13)  ;;  %v1002_v49 = vadd.f32 (!%p1266_p13), %v1269_v41, %v979_v46  ;;  %v987_v1 = vld [vmem:[#allocation4 + $0x58] sm:$0xff] (!%p1266_p13) }
 0x396   : > { %959 = vst [vmem:[#allocation4 + $0x30] sm:$0xff] %v888_v38  ;;  %967 = vst [vmem:[#allocation4 + $0x70] sm:$0xff] %v928_v39  ;;  %v1001_v48 = vadd.f32 (!%p1266_p13), %v1269_v41, %v978_v45  ;;  %v986_v60 = vld [vmem:[#allocation4 + $0x50] sm:$0xff] (!%p1266_p13)  ;;  %v1010_v12 = vadd.f32 (!%p1266_p13), %v1269_v41, %v987_v1  ;;  %v1023_v14 = vmax.f32 (!%p1266_p13), %v1007_v6, 0.0 }
 0x397   : > { %v1018_v62 = vmax.f32 %v1002_v49, 0.0  ;;  %1033 = vst [vmem:[#allocation3] sm:$0xff] %v1015_v54  ;;  %1049 = vst [vmem:[%s2213_s30] sm:$0xff] %v1015_v54  ;;  %v1009_v11 = vadd.f32 %v1269_v41, %v986_v60 }
 0x398   : > { %v981_v51 = vld [vmem:[#allocation4 + $0x28] sm:$0xff]  ;;  %v1017_v61 = vmax.f32 %v1001_v48, 0.0  ;;  %1034 = vst [vmem:[#allocation3 + $0x8] sm:$0xff] %v1016_v55  ;;  %1050 = vst [vmem:[%s2213_s30 + $0x8] sm:$0xff] %v1016_v55  ;;  %v1026_v19 = vmax.f32 %v1010_v12, 0.0 }
 0x399   : > { %v980_v47 = vld [vmem:[#allocation4 + $0x20] sm:$0xff]  ;;  %v1004_v56 = vadd.f32 %v1269_v41, %v981_v51  ;;  %v989_v3 = vld [vmem:[#allocation4 + $0x68] sm:$0xff]  ;;  %1036 = vst [vmem:[#allocation3 + $0x18] sm:$0xff] %v1018_v62  ;;  %1052 = vst [vmem:[%s2213_s30 + $0x18] sm:$0xff] %v1018_v62  ;;  %v1025_v18 = vmax.f32 %v1009_v11, 0.0 }
 0x39a   : > { %v1003_v50 = vadd.f32 %v1269_v41, %v980_v47  ;;  %v988_v2 = vld [vmem:[#allocation4 + $0x60] sm:$0xff]  ;;  %1035 = vst [vmem:[#allocation3 + $0x10] sm:$0xff] %v1017_v61  ;;  %1051 = vst [vmem:[%s2213_s30 + $0x10] sm:$0xff] %v1017_v61  ;;  %v1012_v16 = vadd.f32 %v1269_v41, %v989_v3 }
 0x39b   : > { %v1020_v4 = vmax.f32 %v1004_v56, 0.0  ;;  %v1011_v13 = vadd.f32 %v1269_v41, %v988_v2  ;;  %1041 = vst [vmem:[#allocation3 + $0x40] sm:$0xff] %v1023_v14  ;;  %1057 = vst [vmem:[%s2213_s30 + $0x40] sm:$0xff] %v1023_v14 }
 0x39c   : > { %v983_v53 = vld [vmem:[#allocation4 + $0x38] sm:$0xff]  ;;  %v1019_v63 = vmax.f32 %v1003_v50, 0.0  ;;  %1042 = vst [vmem:[#allocation3 + $0x48] sm:$0xff] %v1024_v15  ;;  %1058 = vst [vmem:[%s2213_s30 + $0x48] sm:$0xff] %v1024_v15  ;;  %v1028_v22 = vmax.f32 %v1012_v16, 0.0 }
 0x39d   : > { %v982_v52 = vld [vmem:[#allocation4 + $0x30] sm:$0xff]  ;;  %v1006_v0 = vadd.f32 %v1269_v41, %v983_v53  ;;  %v991_v9 = vld [vmem:[#allocation4 + $0x78] sm:$0xff]  ;;  %1038 = vst [vmem:[#allocation3 + $0x28] sm:$0xff] %v1020_v4  ;;  %1054 = vst [vmem:[%s2213_s30 + $0x28] sm:$0xff] %v1020_v4  ;;  %v1027_v20 = vmax.f32 %v1011_v13, 0.0 }
 0x39e   : > { %v1005_v57 = vadd.f32 %v1269_v41, %v982_v52  ;;  %v990_v8 = vld [vmem:[#allocation4 + $0x70] sm:$0xff]  ;;  %1037 = vst [vmem:[#allocation3 + $0x20] sm:$0xff] %v1019_v63  ;;  %1053 = vst [vmem:[%s2213_s30 + $0x20] sm:$0xff] %v1019_v63  ;;  %v1014_v21 = vadd.f32 %v1269_v41, %v991_v9 }
 0x39f   : > { %v1022_v10 = vmax.f32 %v1006_v0, 0.0  ;;  %v1013_v17 = vadd.f32 %v1269_v41, %v990_v8  ;;  %1043 = vst [vmem:[#allocation3 + $0x50] sm:$0xff] %v1025_v18  ;;  %1059 = vst [vmem:[%s2213_s30 + $0x50] sm:$0xff] %v1025_v18 }
 0x3a0   : > { %v1021_v5 = vmax.f32 %v1005_v57, 0.0  ;;  %1044 = vst [vmem:[#allocation3 + $0x58] sm:$0xff] %v1026_v19  ;;  %1060 = vst [vmem:[%s2213_s30 + $0x58] sm:$0xff] %v1026_v19  ;;  %v1030_v24 = vmax.f32 %v1014_v21, 0.0 }
 0x3a1   : > { %1040 = vst [vmem:[#allocation3 + $0x38] sm:$0xff] %v1022_v10  ;;  %1056 = vst [vmem:[%s2213_s30 + $0x38] sm:$0xff] %v1022_v10  ;;  %v1029_v23 = vmax.f32 %v1013_v17, 0.0 }
 0x3a2   : > { %1039 = vst [vmem:[#allocation3 + $0x30] sm:$0xff] %v1021_v5  ;;  %1055 = vst [vmem:[%s2213_s30 + $0x30] sm:$0xff] %v1021_v5 }
 0x3a3   : > { %1045 = vst [vmem:[#allocation3 + $0x60] sm:$0xff] %v1027_v20  ;;  %1061 = vst [vmem:[%s2213_s30 + $0x60] sm:$0xff] %v1027_v20 }
 0x3a4   : > { %1046 = vst [vmem:[#allocation3 + $0x68] sm:$0xff] %v1028_v22  ;;  %1062 = vst [vmem:[%s2213_s30 + $0x68] sm:$0xff] %v1028_v22 }
 0x3a5   : > { %1047 = vst [vmem:[#allocation3 + $0x70] sm:$0xff] %v1029_v23  ;;  %1063 = vst [vmem:[%s2213_s30 + $0x70] sm:$0xff] %v1029_v23 }
 0x3a6   : > { %1048 = vst [vmem:[#allocation3 + $0x78] sm:$0xff] %v1030_v24  ;;  %1064 = vst [vmem:[%s2213_s30 + $0x78] sm:$0xff] %v1030_v24 }
 0x3a7 PF: > { %1068 = sbr.rel (%p1267_p8) target bundleno = 947 (0x3b3), region = 88  ;;  %v1069_v25 = vld [vmem:[#allocation4] sm:$0xff] (!%p1267_p8)  ;;  %v1070_v27 = vld [vmem:[#allocation4 + $0x8] sm:$0xff] (!%p1267_p8)  ;;  %v1071_v30 = vld [vmem:[#allocation4 + $0x10] sm:$0xff] (!%p1267_p8) }
 0x3a8   : > { %v1271_v26 = vld [vmem:[%s2325_s5] ss:$0 sm:$0xff] (!%p1267_p8)  ;;  %v1072_v31 = vld [vmem:[#allocation4 + $0x18] sm:$0xff] (!%p1267_p8)  ;;  %v1074_v36 = vld [vmem:[#allocation4 + $0x28] sm:$0xff] (!%p1267_p8) }
 0x3a9   : > { %v1092_v28 = vadd.f32 (!%p1267_p8), %v1271_v26, %v1069_v25  ;;  %v1093_v29 = vadd.f32 (!%p1267_p8), %v1271_v26, %v1070_v27  ;;  %v1073_v32 = vld [vmem:[#allocation4 + $0x20] sm:$0xff] (!%p1267_p8)  ;;  %v1094_v33 = vadd.f32 (!%p1267_p8), %v1271_v26, %v1071_v30  ;;  %v1095_v34 = vadd.f32 (!%p1267_p8), %v1271_v26, %v1072_v31  ;;  %v1078_v43 = vld [vmem:[#allocation4 + $0x48] sm:$0xff] (!%p1267_p8)  ;;  %v1079_v44 = vld [vmem:[#allocation4 + $0x50] sm:$0xff] (!%p1267_p8) }
 0x3aa   : > { %v1096_v35 = vadd.f32 (!%p1267_p8), %v1271_v26, %v1073_v32  ;;  %v1097_v39 = vadd.f32 (!%p1267_p8), %v1271_v26, %v1074_v36  ;;  %v1077_v42 = vld [vmem:[#allocation4 + $0x40] sm:$0xff] (!%p1267_p8)  ;;  %v1101_v46 = vadd.f32 (!%p1267_p8), %v1271_v26, %v1078_v43  ;;  %v1102_v47 = vadd.f32 (!%p1267_p8), %v1271_v26, %v1079_v44  ;;  %v1080_v48 = vld [vmem:[#allocation4 + $0x58] sm:$0xff] (!%p1267_p8)  ;;  %v1082_v50 = vld [vmem:[#allocation4 + $0x68] sm:$0xff] (!%p1267_p8) }
 0x3ab   : > { %1108 = vst [vmem:[%s2213_s30] sm:$0xff] (!%p1267_p8), %v1092_v28  ;;  %1109 = vst [vmem:[%s2213_s30 + $0x8] sm:$0xff] (!%p1267_p8), %v1093_v29  ;;  %v1100_v45 = vadd.f32 (!%p1267_p8), %v1271_v26, %v1077_v42  ;;  %v1081_v49 = vld [vmem:[#allocation4 + $0x60] sm:$0xff] (!%p1267_p8)  ;;  %v1103_v51 = vadd.f32 (!%p1267_p8), %v1271_v26, %v1080_v48  ;;  %v1105_v53 = vadd.f32 (!%p1267_p8), %v1271_v26, %v1082_v50 }
 0x3ac   : > { %v1076_v38 = vld [vmem:[#allocation4 + $0x38] sm:$0xff] (!%p1267_p8)  ;;  %1110 = vst [vmem:[%s2213_s30 + $0x10] sm:$0xff] (!%p1267_p8), %v1094_v33  ;;  %1111 = vst [vmem:[%s2213_s30 + $0x18] sm:$0xff] (!%p1267_p8), %v1095_v34  ;;  %v1104_v52 = vadd.f32 (!%p1267_p8), %v1271_v26, %v1081_v49 }
 0x3ad   : > { %v1075_v37 = vld [vmem:[#allocation4 + $0x30] sm:$0xff] (!%p1267_p8)  ;;  %v1099_v41 = vadd.f32 (!%p1267_p8), %v1271_v26, %v1076_v38  ;;  %1112 = vst [vmem:[%s2213_s30 + $0x20] sm:$0xff] (!%p1267_p8), %v1096_v35  ;;  %1113 = vst [vmem:[%s2213_s30 + $0x28] sm:$0xff] (!%p1267_p8), %v1097_v39  ;;  %v1084_v55 = vld [vmem:[#allocation4 + $0x78] sm:$0xff] (!%p1267_p8) }
 0x3ae   : > { %v1098_v40 = vadd.f32 %v1271_v26, %v1075_v37  ;;  %v1083_v54 = vld [vmem:[#allocation4 + $0x70] sm:$0xff]  ;;  %1116 = vst [vmem:[%s2213_s30 + $0x40] sm:$0xff] %v1100_v45  ;;  %1117 = vst [vmem:[%s2213_s30 + $0x48] sm:$0xff] %v1101_v46  ;;  %v1107_v57 = vadd.f32 %v1271_v26, %v1084_v55 }
 0x3af   : > { %1115 = vst [vmem:[%s2213_s30 + $0x38] sm:$0xff] %v1099_v41  ;;  %1118 = vst [vmem:[%s2213_s30 + $0x50] sm:$0xff] %v1102_v47  ;;  %v1106_v56 = vadd.f32 %v1271_v26, %v1083_v54 }
 0x3b0   : > { %1114 = vst [vmem:[%s2213_s30 + $0x30] sm:$0xff] %v1098_v40  ;;  %1119 = vst [vmem:[%s2213_s30 + $0x58] sm:$0xff] %v1103_v51 }
 0x3b1   : > { %1120 = vst [vmem:[%s2213_s30 + $0x60] sm:$0xff] %v1104_v52  ;;  %1121 = vst [vmem:[%s2213_s30 + $0x68] sm:$0xff] %v1105_v53 }
 0x3b2   : > { %1122 = vst [vmem:[%s2213_s30 + $0x70] sm:$0xff] %v1106_v56  ;;  %1123 = vst [vmem:[%s2213_s30 + $0x78] sm:$0xff] %v1107_v57 }
 0x3b3 PF: > { %s1277_s1 = sshll.u32 %s1981_s24, 11  ;;  %s1140_s27 = sshll.u32 %s2213_s30, 4  ;;  %s2270_s27 = int_to_ptr.vmem [resolvable:$true] %s1140_s27 }
 0x3b4   : > { %s2267_s10 = scalar_lea.hbm %s2326_s6, %s1277_s1  ;;  %s2274_s8 = scalar_lea.sflag [#allocation7], %s318_s11 }
 0x3b5   : > { %s1899_s13 = scalar_lea.vmem %s2270_s27, 2048  ;;  %p2348_p11 = scmp.ne.s32.totalorder %s2338_s7, 0 }
 0x3b6   : > { %p1900_p10 = scmp.ne.s32.totalorder %s2270_s27, %s1899_s13  ;;  %s1997_s24 = smov [#allocation13]  }
 0x3b7   : > { %s1903_s16 = sshll.u32 %s1997_s24, 4  ;;  %s1904_s16 = int_to_ptr.vmem [resolvable:$false] %s1903_s16 }
 0x3b8   : > { %p1901_p0 = pnand %p1900_p10, %p2348_p11  ;;  %s1905_s20 = scalar_lea.vmem %s1904_s16, 4096 }
 0x3b9   : > { %p1906_p3 = scmp.lt.s32.totalorder %s2270_s27, %s1904_s16  ;;  %p1907_p5 = scmp.lt.s32.totalorder %s1905_s20, %s1899_s13 }
 0x3ba   : > { %p1902_p2 = pneg %p1901_p0 }
 0x3bb   : > { %p1908_p6 = por %p1907_p5, %p1906_p3 }
 0x3bd   : > { %p1909_p7 = pnand %p1908_p6, %p1902_p2 }
 0x3bf   : > { %1912 = shalt.err (!%p1909_p7)
}
 0x3c0   : > { %s1913_s25 = scalar_lea.hbm %s2267_s10, 2048  ;;  %s1917_s11 = scalar_lea.hbm %s2326_s6, 4096 }
 0x3c1   : > { %p1914_p9 = scmp.ne.s32.totalorder %s2267_s10, %s1913_s25  ;;  %p1918_p1 = scmp.lt.u32.totalorder %s2267_s10, %s2326_s6 }
 0x3c2   : > { %p1919_p13 = scmp.lt.u32.totalorder %s1917_s11, %s1913_s25  ;;  %p1921_p10 = scmp.lt.u32.totalorder %s1913_s25, %s2267_s10 }
 0x3c3   : > { %p1915_p12 = pnand %p1914_p9, %p2348_p11 }
 0x3c4   : > { %p1920_p8 = por %p1919_p13, %p1918_p1 }
 0x3c5   : > { %p1916_p4 = pneg %p1915_p12 }
 0x3c6   : > { %p1922_p0 = por %p1921_p10, %p1920_p8 }
 0x3c8   : > { %p1923_p2 = pnand %p1922_p0, %p1916_p4 }
 0x3ca   : > { %1926 = shalt.err (!%p1923_p2)
}
 0x3cb   : > { %s1998_s12 = smov 128   ;;  %s1999_s18 = smov 8  }
 0x3cc   : > { %1702 = dma.vmem_to_hbm [thread:$0]  (%p2348_p11), %s2270_s27, 2048, %s2267_s10, %s2274_s8, %s1998_s12, %s1998_s12, %s1999_s18  }
 0x3cd PF: > { %p1729_p3 = scmp.ge.s32.totalorder %s1989_s26, 2  ;;  %s1155_s19 = sand.u32 1, %s1969_s21  }
 0x3ce   : > { %p2349_p5 = scmp.ne.s32.totalorder %s2339_s9, 0  ;;  %s1156_s28 = scalar_lea.sflag [#allocation7], %s1155_s19 }
 0x3d0   : > { %p1718_p6 = pnand %p1729_p3, %p2349_p5 }
 0x3d2   : > { %1964 = dma.done.wait (!%p1718_p6), %s1156_s28, 2048  }
 0x3d3   : > { %1966 = vsyncadd (!%p1718_p6), %s1156_s28, 4294965248  ;;  %s22_s26 = sadd.s32 1, %s1989_s26   ;;  %s2350_s1 = sld [smem:[#allocation18_spill]] }
 0x3d4   : > { %p19_p7 = scmp.ge.s32.totalorder %s22_s26, 4   ;;  %s2351_s23 = sld [smem:[#allocation21_spill]] }
 0x3d5   : > { %s2352_s24 = sld [smem:[#allocation19_spill]]  ;;  %s2353_s25 = sld [smem:[#allocation20_spill]] }
 0x3d6   : > { %s2354_s21 = smov %s1973_s22  ;;  %21 = sbr.rel (!%p19_p7) target bundleno = 9 (0x9), region = 124 }
 0x3d9   : > { %s2355_s22 = smov %s2350_s1 }
 0x3dd   :  { %1161 = vsyncpa [#allocation6], 1 }
 0x3de   :  { %1163 = vsyncpa [#allocation6 + $0x1], 1 }
 0x3df   :  { %1164 = vsyncpa [#allocation9], 1 }
 0x3e0   :  { %1165 = vsyncpa [#allocation12], 1 }
 0x3e1   :  { %1166 = vsyncpa [#allocation7], 1 }
 0x3e2   :  { %1168 = vsyncpa [#allocation7 + $0x1], 1 }

</bundles_post_ra>
